<compile_context>
chip_gen: v7x
topology: tpu7x:2x2x1
jax: 0.10.0
libtpu: 0.0.40
codegen_flags: <defaults>
</compile_context>

<pallas_src>
import functools

import jax
import jax.numpy as jnp
from jax.experimental import pallas as pl
from jax.experimental.pallas import tpu as pltpu

EPS = 1e-5
NEG_SLOPE = 0.2


def _vmem_limit_bytes():
    """Generation-aware scoped-VMEM limit (v5e/v6e: 128 MiB parts; v7x: 64 MiB)."""
    try:
        cap = pltpu.get_tpu_info().vmem_capacity_bytes
    except Exception:
        return 32 * 1024 * 1024
    return int(min(cap * 3 // 4, 96 * 1024 * 1024))


def _pick_co_tile(c_out, s, max_slab_bytes=4 << 20):
    """C_out tile: a multiple of 8 (or full C_out), bounding the f32 (TCo, S) slab in VMEM,
    preferring >= 2 tiles so both v7x TensorCores get work even when N == 1."""
    if c_out % 8 != 0:
        return c_out                      # can't tile cleanly -> full extent (small layers)
    cands = [t for t in range(8, c_out + 1, 8) if c_out % t == 0]
    fit = [t for t in cands if t * s * 4 <= max_slab_bytes] or [8]
    multi = [t for t in fit if c_out // t >= 2]
    return max(multi) if multi else max(fit)


# --------------------------------------------------------------------------- fused kernel
def _fused_kernel(pf_ref, wg_ref, o_ref, *, s, w_out):
    # pf_ref: (1, 2, 2, 2*C_in, F) bf16, F = (H_out+1)*W_out, flat spatial on lanes.
    #         pf[0, rh, rw, qw*C_in + ci, a*W_out + b] = x_pad[ci, 2a + rh, 2(b + qw) + rw]
    # wg_ref: (2, 2, 2, TCo, 2*C_in) bf16,
    #         wg[rh, rw, qh, co, qw*C_in + ci] = w[co, ci, 2*qh + rh, 2*qw + rw]
    # o_ref : (1, TCo, S)
    #
    # Conv: y[co, s] = sum_{rh,rw,qh} wg[rh,rw,qh] @ pf[0,rh,rw,:, s + qh*W_out]
    # (the qh shift of the 4x4 window is a pure lane-offset of the flattened spatial axis).
    acc = None
    for rh in range(2):
        for rw in range(2):
            for qh in range(2):
                slab = pf_ref[0, rh, rw, :, pl.ds(qh * w_out, s)]          # (2*C_in, S) bf16
                part = jnp.dot(wg_ref[rh, rw, qh], slab,
                               preferred_element_type=jnp.float32)         # (TCo, S) f32
                acc = part if acc is None else acc + part

    # InstanceNorm (affine=False) over the spatial axis, shifted two-pass variance.
    inv_s = 1.0 / s
    mean = jnp.sum(acc, axis=1, keepdims=True) * inv_s                     # (TCo, 1)
    cen = acc - mean
    var = jnp.sum(cen * cen, axis=1, keepdims=True) * inv_s
    yn = cen * jax.lax.rsqrt(var + EPS)
    # LeakyReLU(0.2)
    o_ref[0] = jnp.where(yn > 0.0, yn, NEG_SLOPE * yn).astype(o_ref.dtype)


# --------------------------------------------------------------------------- host helpers
def _build_patches(x_bf16, h_out, w_out):
    """(N, C, H, W) bf16 -> half-im2col (N, 2, 2, 2*C, (H_out+1)*W_out) bf16.

    Pads by 1, space-to-depths the stride-2 phases (rh, rw) and pre-shifts the kernel-width
    phase qw (2x duplication only); the kernel-height phase qh is left to the kernel as a
    lane-offset slice, so the full 4x im2col is never materialized in HBM."""
    n, c, h, w = x_bf16.shape
    xp = jnp.pad(x_bf16, ((0, 0), (0, 0), (1, 1), (1, 1)))                 # (N, C, H+2, W+2)
    xr = xp.reshape(n, c, h_out + 1, 2, w + 2)                             # [n, c, a, rh, col]
    parts = []
    for rh in range(2):
        for rw in range(2):
            for qw in range(2):
                start = 2 * qw + rw
                parts.append(xr[:, :, :, rh, start:start + 2 * w_out:2])   # (N, C, H_out+1, W_out)
    pf = jnp.stack(parts, axis=1)                                          # (N, 8, C, Ha, Wo)
    pf = pf.reshape(n, 2, 2, 2, c, h_out + 1, w_out)                       # [n, rh, rw, qw, c, a, b]
    return pf.reshape(n, 2, 2, 2 * c, (h_out + 1) * w_out)


def _regroup_weight(weight_bf16):
    """(C_out, C_in, 4, 4) -> (2, 2, 2, C_out, 2*C_in), indexed [rh, rw, qh, co, qw*C_in+ci]."""
    c_out, c_in = weight_bf16.shape[:2]
    w4 = weight_bf16.reshape(c_out, c_in, 2, 2, 2, 2)                      # [co, ci, qh, rh, qw, rw]
    wg = jnp.transpose(w4, (3, 5, 2, 0, 4, 1))                             # [rh, rw, qh, co, qw, ci]
    return wg.reshape(2, 2, 2, c_out, 2 * c_in)


def discriminate_block(x_nchw, weight, bias=None, *, out_dtype=None):
    """Conv2d(4, stride=2, pad=1) -> InstanceNorm2d(affine=False) -> LeakyReLU(0.2), NCHW out.

    `bias` is accepted for interface parity but intentionally unused: a per-channel conv bias
    is exactly cancelled by InstanceNorm2d(affine=False)'s per-channel mean subtraction.
    Pass out_dtype=jnp.bfloat16 when this block feeds another DiscriminateBlock to halve the
    writeback / next layer's read bytes.
    """
    del bias
    n, c_in, h, w = x_nchw.shape
    assert h % 2 == 0 and w % 2 == 0, "H and W must be even for k=4, s=2, p=1"
    # TODO(synk): odd H/W (H_out = floor(H/2)) needs a slightly different phase split.
    c_out = weight.shape[0]
    h_out, w_out = h // 2, w // 2
    s = h_out * w_out
    f = (h_out + 1) * w_out
    out_dtype = x_nchw.dtype if out_dtype is None else out_dtype

    pf = _build_patches(x_nchw.astype(jnp.bfloat16), h_out, w_out)         # (N,2,2,2C,F) bf16
    wg = _regroup_weight(weight.astype(jnp.bfloat16))                      # (2,2,2,Cout,2C) bf16

    co_tile = _pick_co_tile(c_out, s)
    num_co = c_out // co_tile

    out = pl.pallas_call(
        functools.partial(_fused_kernel, s=s, w_out=w_out),
        out_shape=jax.ShapeDtypeStruct((n, c_out, s), out_dtype),
        grid=(n, num_co),
        in_specs=[
            # Whole (reshaped) image per batch index; block index is constant across the co
            # axis so it is not re-fetched between co steps.
            pl.BlockSpec((1, 2, 2, 2 * c_in, f), lambda b, co: (b, 0, 0, 0, 0)),
            pl.BlockSpec((2, 2, 2, co_tile, 2 * c_in), lambda b, co: (0, 0, 0, co, 0)),
        ],
        out_specs=pl.BlockSpec((1, co_tile, s), lambda b, co: (b, co, 0)),
        compiler_params=pltpu.CompilerParams(
            dimension_semantics=("parallel", "parallel"),
            vmem_limit_bytes=_vmem_limit_bytes(),
        ),
    )(pf, wg)

    # (N, C_out, S) is channels-major already: pure reshape, no transpose.
    return out.reshape(n, c_out, h_out, w_out)


# --------------------------------------------------------------------------- reference
def _reference(x, weight, bias):
    # Same bf16 input rounding as the kernel path, conv in f32 (HIGHEST); bias included to
    # demonstrate it is cancelled by InstanceNorm(affine=False).
    xr = x.astype(jnp.bfloat16).astype(jnp.float32)
    wr = weight.astype(jnp.bfloat16).astype(jnp.float32)
    y = jax.lax.conv_general_dilated(
        xr, wr, window_strides=(2, 2), padding=((1, 1), (1, 1)),
        dimension_numbers=("NCHW", "OIHW", "NCHW"),
        precision=jax.lax.Precision.HIGHEST,
    ) + bias[None, :, None, None]
    mean = jnp.mean(y, axis=(2, 3), keepdims=True)
    var = jnp.mean((y - mean) ** 2, axis=(2, 3), keepdims=True)
    y = (y - mean) / jnp.sqrt(var + EPS)
    return jnp.where(y > 0, y, NEG_SLOPE * y)


if __name__ == "__main__":
    key = jax.random.PRNGKey(0)
    kx, kw, kb = jax.random.split(key, 3)

    N, C_in, H, W = 2, 4, 16, 16
    C_out = 8

    x = jax.random.normal(kx, (N, C_in, H, W), dtype=jnp.float32)
    # Kaiming-uniform-ish bound like torch Conv2d default init.
    fan_in = C_in * 4 * 4
    bound = 1.0 / (fan_in ** 0.5)
    weight = jax.random.uniform(kw, (C_out, C_in, 4, 4), jnp.float32, -bound, bound)
    bias = jax.random.uniform(kb, (C_out,), jnp.float32, -bound, bound)

    out = discriminate_block(x, weight, bias)
    out = jax.block_until_ready(out)

    ref = _reference(x, weight, bias)
    assert out.shape == (N, C_out, H // 2, W // 2), out.shape
    max_err = float(jnp.max(jnp.abs(out - ref)))
    assert jnp.allclose(out, ref, atol=2e-3, rtol=2e-3), max_err

    print("KERNEL_OK")
</pallas_src>

<mosaic_0001>
module attributes {stable_mosaic.version = 11 : i64} {
  func.func @_fused_kernel(%arg0: i32, %arg1: i32, %arg2: memref<1x2x2x8x72xbf16, #tpu.memory_space<vmem>>, %arg3: memref<2x2x2x8x8xbf16, #tpu.memory_space<vmem>>, %arg4: memref<1x8x64xf32, #tpu.memory_space<vmem>>) attributes {dimension_semantics = [#tpu.dimension_semantics<parallel>, #tpu.dimension_semantics<parallel>], iteration_bounds = array<i64: 2, 1>, scalar_prefetch = 0 : i64, scratch_operands = 0 : i64, tpu.core_type = #tpu.core_type<tc>, window_params = [{transform_indices = @transform_0, window_bounds = array<i64: 1, 2, 2, 8, 72>}, {transform_indices = @transform_1, window_bounds = array<i64: 2, 2, 2, 8, 8>}, {transform_indices = @transform_2, window_bounds = array<i64: 1, 8, 64>}]} {
    %c0 = arith.constant 0 : index
    %c0_0 = arith.constant 0 : index
    %c0_1 = arith.constant 0 : index
    %c0_2 = arith.constant 0 : index
    %c0_3 = arith.constant 0 : index
    %0 = vector.load %arg2[%c0, %c0_0, %c0_1, %c0_2, %c0_3] : memref<1x2x2x8x72xbf16, #tpu.memory_space<vmem>>, vector<1x1x1x8x64xbf16>
    %1 = vector.shape_cast %0 : vector<1x1x1x8x64xbf16> to vector<8x64xbf16>
    %c0_4 = arith.constant 0 : index
    %c0_5 = arith.constant 0 : index
    %c0_6 = arith.constant 0 : index
    %c0_7 = arith.constant 0 : index
    %c0_8 = arith.constant 0 : index
    %2 = vector.load %arg3[%c0_4, %c0_5, %c0_6, %c0_7, %c0_8] : memref<2x2x2x8x8xbf16, #tpu.memory_space<vmem>>, vector<1x1x1x8x8xbf16>
    %3 = vector.shape_cast %2 : vector<1x1x1x8x8xbf16> to vector<8x8xbf16>
    %cst = arith.constant dense<0.000000e+00> : vector<8x64xf32>
    %4 = tpu.matmul %3, %1, %cst {dimension_numbers = #tpu.dot_dimension_numbers<[1], [0], [0], [1], [0, 0, 1, 1], [], []>} : vector<8x8xbf16>, vector<8x64xbf16>, vector<8x64xf32> -> vector<8x64xf32>
    %c0_9 = arith.constant 0 : index
    %c0_10 = arith.constant 0 : index
    %c0_11 = arith.constant 0 : index
    %c0_12 = arith.constant 0 : index
    %c8 = arith.constant 8 : index
    %5 = vector.load %arg2[%c0_9, %c0_10, %c0_11, %c0_12, %c8] : memref<1x2x2x8x72xbf16, #tpu.memory_space<vmem>>, vector<1x1x1x8x64xbf16>
    %6 = vector.shape_cast %5 : vector<1x1x1x8x64xbf16> to vector<8x64xbf16>
    %c0_13 = arith.constant 0 : index
    %c0_14 = arith.constant 0 : index
    %c1 = arith.constant 1 : index
    %c0_15 = arith.constant 0 : index
    %c0_16 = arith.constant 0 : index
    %7 = vector.load %arg3[%c0_13, %c0_14, %c1, %c0_15, %c0_16] : memref<2x2x2x8x8xbf16, #tpu.memory_space<vmem>>, vector<1x1x1x8x8xbf16>
    %8 = vector.shape_cast %7 : vector<1x1x1x8x8xbf16> to vector<8x8xbf16>
    %cst_17 = arith.constant dense<0.000000e+00> : vector<8x64xf32>
    %9 = tpu.matmul %8, %6, %cst_17 {dimension_numbers = #tpu.dot_dimension_numbers<[1], [0], [0], [1], [0, 0, 1, 1], [], []>} : vector<8x8xbf16>, vector<8x64xbf16>, vector<8x64xf32> -> vector<8x64xf32>
    %10 = arith.addf %4, %9 : vector<8x64xf32>
    %c0_18 = arith.constant 0 : index
    %c0_19 = arith.constant 0 : index
    %c1_20 = arith.constant 1 : index
    %c0_21 = arith.constant 0 : index
    %c0_22 = arith.constant 0 : index
    %11 = vector.load %arg2[%c0_18, %c0_19, %c1_20, %c0_21, %c0_22] : memref<1x2x2x8x72xbf16, #tpu.memory_space<vmem>>, vector<1x1x1x8x64xbf16>
    %12 = vector.shape_cast %11 : vector<1x1x1x8x64xbf16> to vector<8x64xbf16>
    %c0_23 = arith.constant 0 : index
    %c1_24 = arith.constant 1 : index
    %c0_25 = arith.constant 0 : index
    %c0_26 = arith.constant 0 : index
    %c0_27 = arith.constant 0 : index
    %13 = vector.load %arg3[%c0_23, %c1_24, %c0_25, %c0_26, %c0_27] : memref<2x2x2x8x8xbf16, #tpu.memory_space<vmem>>, vector<1x1x1x8x8xbf16>
    %14 = vector.shape_cast %13 : vector<1x1x1x8x8xbf16> to vector<8x8xbf16>
    %cst_28 = arith.constant dense<0.000000e+00> : vector<8x64xf32>
    %15 = tpu.matmul %14, %12, %cst_28 {dimension_numbers = #tpu.dot_dimension_numbers<[1], [0], [0], [1], [0, 0, 1, 1], [], []>} : vector<8x8xbf16>, vector<8x64xbf16>, vector<8x64xf32> -> vector<8x64xf32>
    %16 = arith.addf %10, %15 : vector<8x64xf32>
    %c0_29 = arith.constant 0 : index
    %c0_30 = arith.constant 0 : index
    %c1_31 = arith.constant 1 : index
    %c0_32 = arith.constant 0 : index
    %c8_33 = arith.constant 8 : index
    %17 = vector.load %arg2[%c0_29, %c0_30, %c1_31, %c0_32, %c8_33] : memref<1x2x2x8x72xbf16, #tpu.memory_space<vmem>>, vector<1x1x1x8x64xbf16>
    %18 = vector.shape_cast %17 : vector<1x1x1x8x64xbf16> to vector<8x64xbf16>
    %c0_34 = arith.constant 0 : index
    %c1_35 = arith.constant 1 : index
    %c1_36 = arith.constant 1 : index
    %c0_37 = arith.constant 0 : index
    %c0_38 = arith.constant 0 : index
    %19 = vector.load %arg3[%c0_34, %c1_35, %c1_36, %c0_37, %c0_38] : memref<2x2x2x8x8xbf16, #tpu.memory_space<vmem>>, vector<1x1x1x8x8xbf16>
    %20 = vector.shape_cast %19 : vector<1x1x1x8x8xbf16> to vector<8x8xbf16>
    %cst_39 = arith.constant dense<0.000000e+00> : vector<8x64xf32>
    %21 = tpu.matmul %20, %18, %cst_39 {dimension_numbers = #tpu.dot_dimension_numbers<[1], [0], [0], [1], [0, 0, 1, 1], [], []>} : vector<8x8xbf16>, vector<8x64xbf16>, vector<8x64xf32> -> vector<8x64xf32>
    %22 = arith.addf %16, %21 : vector<8x64xf32>
    %c0_40 = arith.constant 0 : index
    %c1_41 = arith.constant 1 : index
    %c0_42 = arith.constant 0 : index
    %c0_43 = arith.constant 0 : index
    %c0_44 = arith.constant 0 : index
    %23 = vector.load %arg2[%c0_40, %c1_41, %c0_42, %c0_43, %c0_44] : memref<1x2x2x8x72xbf16, #tpu.memory_space<vmem>>, vector<1x1x1x8x64xbf16>
    %24 = vector.shape_cast %23 : vector<1x1x1x8x64xbf16> to vector<8x64xbf16>
    %c1_45 = arith.constant 1 : index
    %c0_46 = arith.constant 0 : index
    %c0_47 = arith.constant 0 : index
    %c0_48 = arith.constant 0 : index
    %c0_49 = arith.constant 0 : index
    %25 = vector.load %arg3[%c1_45, %c0_46, %c0_47, %c0_48, %c0_49] : memref<2x2x2x8x8xbf16, #tpu.memory_space<vmem>>, vector<1x1x1x8x8xbf16>
    %26 = vector.shape_cast %25 : vector<1x1x1x8x8xbf16> to vector<8x8xbf16>
    %cst_50 = arith.constant dense<0.000000e+00> : vector<8x64xf32>
    %27 = tpu.matmul %26, %24, %cst_50 {dimension_numbers = #tpu.dot_dimension_numbers<[1], [0], [0], [1], [0, 0, 1, 1], [], []>} : vector<8x8xbf16>, vector<8x64xbf16>, vector<8x64xf32> -> vector<8x64xf32>
    %28 = arith.addf %22, %27 : vector<8x64xf32>
    %c0_51 = arith.constant 0 : index
    %c1_52 = arith.constant 1 : index
    %c0_53 = arith.constant 0 : index
    %c0_54 = arith.constant 0 : index
    %c8_55 = arith.constant 8 : index
    %29 = vector.load %arg2[%c0_51, %c1_52, %c0_53, %c0_54, %c8_55] : memref<1x2x2x8x72xbf16, #tpu.memory_space<vmem>>, vector<1x1x1x8x64xbf16>
    %30 = vector.shape_cast %29 : vector<1x1x1x8x64xbf16> to vector<8x64xbf16>
    %c1_56 = arith.constant 1 : index
    %c0_57 = arith.constant 0 : index
    %c1_58 = arith.constant 1 : index
    %c0_59 = arith.constant 0 : index
    %c0_60 = arith.constant 0 : index
    %31 = vector.load %arg3[%c1_56, %c0_57, %c1_58, %c0_59, %c0_60] : memref<2x2x2x8x8xbf16, #tpu.memory_space<vmem>>, vector<1x1x1x8x8xbf16>
    %32 = vector.shape_cast %31 : vector<1x1x1x8x8xbf16> to vector<8x8xbf16>
    %cst_61 = arith.constant dense<0.000000e+00> : vector<8x64xf32>
    %33 = tpu.matmul %32, %30, %cst_61 {dimension_numbers = #tpu.dot_dimension_numbers<[1], [0], [0], [1], [0, 0, 1, 1], [], []>} : vector<8x8xbf16>, vector<8x64xbf16>, vector<8x64xf32> -> vector<8x64xf32>
    %34 = arith.addf %28, %33 : vector<8x64xf32>
    %c0_62 = arith.constant 0 : index
    %c1_63 = arith.constant 1 : index
    %c1_64 = arith.constant 1 : index
    %c0_65 = arith.constant 0 : index
    %c0_66 = arith.constant 0 : index
    %35 = vector.load %arg2[%c0_62, %c1_63, %c1_64, %c0_65, %c0_66] : memref<1x2x2x8x72xbf16, #tpu.memory_space<vmem>>, vector<1x1x1x8x64xbf16>
    %36 = vector.shape_cast %35 : vector<1x1x1x8x64xbf16> to vector<8x64xbf16>
    %c1_67 = arith.constant 1 : index
    %c1_68 = arith.constant 1 : index
    %c0_69 = arith.constant 0 : index
    %c0_70 = arith.constant 0 : index
    %c0_71 = arith.constant 0 : index
    %37 = vector.load %arg3[%c1_67, %c1_68, %c0_69, %c0_70, %c0_71] : memref<2x2x2x8x8xbf16, #tpu.memory_space<vmem>>, vector<1x1x1x8x8xbf16>
    %38 = vector.shape_cast %37 : vector<1x1x1x8x8xbf16> to vector<8x8xbf16>
    %cst_72 = arith.constant dense<0.000000e+00> : vector<8x64xf32>
    %39 = tpu.matmul %38, %36, %cst_72 {dimension_numbers = #tpu.dot_dimension_numbers<[1], [0], [0], [1], [0, 0, 1, 1], [], []>} : vector<8x8xbf16>, vector<8x64xbf16>, vector<8x64xf32> -> vector<8x64xf32>
    %40 = arith.addf %34, %39 : vector<8x64xf32>
    %c0_73 = arith.constant 0 : index
    %c1_74 = arith.constant 1 : index
    %c1_75 = arith.constant 1 : index
    %c0_76 = arith.constant 0 : index
    %c8_77 = arith.constant 8 : index
    %41 = vector.load %arg2[%c0_73, %c1_74, %c1_75, %c0_76, %c8_77] : memref<1x2x2x8x72xbf16, #tpu.memory_space<vmem>>, vector<1x1x1x8x64xbf16>
    %42 = vector.shape_cast %41 : vector<1x1x1x8x64xbf16> to vector<8x64xbf16>
    %c1_78 = arith.constant 1 : index
    %c1_79 = arith.constant 1 : index
    %c1_80 = arith.constant 1 : index
    %c0_81 = arith.constant 0 : index
    %c0_82 = arith.constant 0 : index
    %43 = vector.load %arg3[%c1_78, %c1_79, %c1_80, %c0_81, %c0_82] : memref<2x2x2x8x8xbf16, #tpu.memory_space<vmem>>, vector<1x1x1x8x8xbf16>
    %44 = vector.shape_cast %43 : vector<1x1x1x8x8xbf16> to vector<8x8xbf16>
    %cst_83 = arith.constant dense<0.000000e+00> : vector<8x64xf32>
    %45 = tpu.matmul %44, %42, %cst_83 {dimension_numbers = #tpu.dot_dimension_numbers<[1], [0], [0], [1], [0, 0, 1, 1], [], []>} : vector<8x8xbf16>, vector<8x64xbf16>, vector<8x64xf32> -> vector<8x64xf32>
    %46 = arith.addf %40, %45 : vector<8x64xf32>
    %cst_84 = arith.constant dense<0.000000e+00> : vector<8xf32>
    %47 = vector.multi_reduction <add>, %46, %cst_84 [1] : vector<8x64xf32> to vector<8xf32>
    %48 = vector.shape_cast %47 : vector<8xf32> to vector<8x1xf32>
    %cst_85 = arith.constant 1.562500e-02 : f32
    %49 = vector.broadcast %cst_85 : f32 to vector<8x1xf32>
    %50 = arith.mulf %48, %49 : vector<8x1xf32>
    %51 = vector.broadcast %50 : vector<8x1xf32> to vector<8x64xf32>
    %52 = arith.subf %46, %51 : vector<8x64xf32>
    %53 = arith.mulf %52, %52 : vector<8x64xf32>
    %cst_86 = arith.constant dense<0.000000e+00> : vector<8xf32>
    %54 = vector.multi_reduction <add>, %53, %cst_86 [1] : vector<8x64xf32> to vector<8xf32>
    %55 = vector.shape_cast %54 : vector<8xf32> to vector<8x1xf32>
    %cst_87 = arith.constant 1.562500e-02 : f32
    %56 = vector.broadcast %cst_87 : f32 to vector<8x1xf32>
    %57 = arith.mulf %55, %56 : vector<8x1xf32>
    %cst_88 = arith.constant 9.99999974E-6 : f32
    %58 = vector.broadcast %cst_88 : f32 to vector<8x1xf32>
    %59 = arith.addf %57, %58 : vector<8x1xf32>
    %60 = math.rsqrt %59 : vector<8x1xf32>
    %61 = vector.broadcast %60 : vector<8x1xf32> to vector<8x64xf32>
    %62 = arith.mulf %52, %61 : vector<8x64xf32>
    %cst_89 = arith.constant 0.000000e+00 : f32
    %63 = vector.broadcast %cst_89 : f32 to vector<8x64xf32>
    %64 = arith.cmpf ogt, %62, %63 : vector<8x64xf32>
    %cst_90 = arith.constant 2.000000e-01 : f32
    %65 = vector.broadcast %cst_90 : f32 to vector<8x64xf32>
    %66 = arith.mulf %65, %62 : vector<8x64xf32>
    %67 = arith.select %64, %62, %66 : vector<8x64xi1>, vector<8x64xf32>
    %c0_91 = arith.constant 0 : index
    %c0_92 = arith.constant 0 : index
    %c0_93 = arith.constant 0 : index
    %68 = vector.load %arg4[%c0_91, %c0_92, %c0_93] : memref<1x8x64xf32, #tpu.memory_space<vmem>>, vector<1x8x64xf32>
    %69 = vector.shape_cast %68 : vector<1x8x64xf32> to vector<8x64xf32>
    %70 = vector.shape_cast %67 : vector<8x64xf32> to vector<1x8x64xf32>
    tpu.vector_store %arg4[%c0_91, %c0_92, %c0_93], %70 {strides = array<i32>} : memref<1x8x64xf32, #tpu.memory_space<vmem>>, vector<1x8x64xf32>,
    return
  }
  func.func @transform_0(%arg0: i32, %arg1: i32) -> (i32, i32, i32, i32, i32) {
    %c0_i32 = arith.constant 0 : i32
    %c0_i32_0 = arith.constant 0 : i32
    %c0_i32_1 = arith.constant 0 : i32
    %c0_i32_2 = arith.constant 0 : i32
    %c0_i32_3 = arith.constant 0 : i32
    return %arg0, %c0_i32, %c0_i32_0, %c0_i32_1, %c0_i32_2 : i32, i32, i32, i32, i32
  }
  func.func @transform_1(%arg0: i32, %arg1: i32) -> (i32, i32, i32, i32, i32) {
    %c0_i32 = arith.constant 0 : i32
    %c0_i32_0 = arith.constant 0 : i32
    %c0_i32_1 = arith.constant 0 : i32
    %c0_i32_2 = arith.constant 0 : i32
    %c0_i32_3 = arith.constant 0 : i32
    return %c0_i32, %c0_i32_0, %c0_i32_1, %arg1, %c0_i32_2 : i32, i32, i32, i32, i32
  }
  func.func @transform_2(%arg0: i32, %arg1: i32) -> (i32, i32, i32) {
    %c0_i32 = arith.constant 0 : i32
    %c0_i32_0 = arith.constant 0 : i32
    return %arg0, %arg1, %c0_i32 : i32, i32, i32
  }
}

</mosaic_0001>

<bundles_post_ra>
// kernel: tpu_custom_call.1
= control target key start
LH: loop header
LB: loop body
LE: loop exit
PB: predicated region body
PF: predicated region fallthrough
CT: control target
= control target key end

     0   :  { %7 = vsyncpa [#allocation3], 0  ;;  %s1382_s0 = inlined_call_operand.hbm [shape: bf16[2,2,2,8,72], index: 0, kind: input, shape index: {}]   ;;  %s1383_s1 = inlined_call_operand.hbm [shape: bf16[2,2,2,8,8], index: 1, kind: input, shape index: {}]   ;;  %s1384_s2 = inlined_call_operand.hbm [shape: f32[2,8,64], index: 2, kind: output, shape index: {}]  }
   0x1   :  { %9 = vsyncpa [#allocation3 + $0x1], 0 }
   0x2   :  { %10 = vsyncpa [#allocation6], 0 }
   0x3   :  { %11 = vsyncpa [#allocation4], 0 }
   0x4   :  { %13 = vsyncpa [#allocation4 + $0x1], 0  ;;  %s1115_s9 = smov 0   ;;  %s1117_s10 = smov 0  }
   0x5   :  { %s1119_s11 = smov 0   ;;  %s1121_s12 = smov 0  }
   0x6   :  { %s1123_s13 = smov 0   ;;  %s1125_s14 = smov 0  }
   0x7 LB: > { %s741_s15 = sadd.s32 4294967295, %s1090_s14   ;;  %s742_s16 = sadd.s32 4294967294, %s1090_s14   ;;  %s1090_s14 = sphi %s1125_s14, %s19_s14   ;;  %s1086_s13 = sphi %s1123_s13, %s1408_s13   ;;  %s1082_s12 = sphi %s1121_s12, %s1407_s12   ;;  %s1078_s11 = sphi %s1119_s11, %s1406_s11   ;;  %s1074_s10 = sphi %s1117_s10, %s1405_s10   ;;  %s1070_s9 = sphi %s1115_s9, %s1404_s9  }
   0x8   : > { %p51_p0 = scmp.ne.s32.totalorder %s1074_s10, %s1070_s9  ;;  %p1149_p1 = scmp.eq.s32.totalorder %s741_s15, 0 }
   0x9   : > { %p1153_p2 = scmp.eq.s32.totalorder %s741_s15, 1  ;;  %p109_p3 = scmp.eq.s32.totalorder %s742_s16, 1 }
   0xa   : > { %s1389_s17 = scalar_select %p1149_p1, 1, 0 }
   0xb   : > { %s1390_s18 = scalar_select %p1153_p2, 1, 0 }
   0xc   : > { %p1159_p4 = por %p1149_p1, %p51_p0  ;;  %p743_p5 = scmp.ge.s32.totalorder %s1090_s14, 1 }
   0xd   : > { %p1164_p6 = por %p109_p3, %p51_p0  ;;  %p116_p7 = scmp.lt.s32.totalorder %s1090_s14, 3 }
   0xe   : > { %s1391_s19 = scalar_select %p1159_p4, 1, 0 }
   0xf   : > { %s1392_s20 = scalar_select %p1164_p6, 1, 0 }
  0x10   : > { %p1169_p8 = pnand %p743_p5, %p116_p7  ;;  %s1092_s22 = smov [#allocation5]  }
  0x11   : > { %s130_s23 = sshll.u32 %s1092_s22, 4  ;;  %s31_s25 = sadd.s32 1, %s1086_s13  ;;  %s131_s23 = int_to_ptr.vmem [resolvable:$true] %s130_s23 }
  0x12   : > { %s1393_s21 = scalar_select %p1169_p8, 1, 0 }
  0x13   : > { %p870_p9 = pneg %p1169_p8  ;;  %s946_s28 = scalar_lea.hbm %s1383_s1, 512 }
  0x14   : > { %p947_p12 = scmp.ne.s32.totalorder %s1383_s1, %s946_s28  ;;  %p953_p5 = scmp.lt.u32.totalorder %s946_s28, %s1383_s1 }
  0x15   : > { %p1178_p11 = pnand %p870_p9, %p1149_p1 }
  0x17   : > { %p948_p13 = pneg %p1178_p11 }
  0x19   : > { %p949_p0 = pnand %p948_p13, %p947_p12 }
  0x1b   : > { %p950_p3 = pneg %p949_p0 }
  0x1d   : > { %p955_p7 = pnand %p953_p5, %p950_p3 }
  0x1f   : > { %958 = shalt.err (!%p955_p7)
}
  0x20   : > { %s959_s5 = scalar_lea.vmem %s131_s23, 512  ;;  %p967_p1 = scmp.lt.s32.totalorder %s131_s23, %s131_s23 }
  0x21   : > { %p960_p9 = scmp.ne.s32.totalorder %s131_s23, %s959_s5  ;;  %p968_p4 = scmp.lt.s32.totalorder %s959_s5, %s959_s5 }
  0x23   : > { %p962_p10 = pnand %p960_p9, %p948_p13  ;;  %p969_p8 = por %p968_p4, %p967_p1 }
  0x25   : > { %p963_p6 = pneg %p962_p10 }
  0x27   : > { %p970_p2 = pnand %p969_p8, %p963_p6 }
  0x29   : > { %973 = shalt.err (!%p970_p2)
}
  0x2a   : > { %s1093_s6 = smov 64   ;;  %s1094_s7 = smov 4  }
  0x2b   : > { %873 = dma.hbm_to_vmem [thread:$0]  (!%p1178_p11), %s1383_s1, 512, %s131_s23, [#allocation6], %s1093_s6, %s1093_s6, %s1094_s7  }
  0x2c   : > { %p33_p1 = scmp.ge.s32.totalorder %s31_s25, 2  ;;  %s38_s16 = sadd.s32 1, %s1078_s11 }
  0x2d   : > { %p45_p2 = scmp.ne.s32.totalorder %s1078_s11, %s1074_s10  ;;  %p46_p4 = scmp.eq.s32.totalorder %s1090_s14, 0 }
  0x2e   : > { %s1410_s25 = smov (%p33_p1, %s31_s25), 0  ;;  %p1396_p8 = scmp.ne.s32.totalorder %s1390_s18, 0 }
  0x2f   : > { %p1208_p6 = por %p46_p4, %p45_p2  ;;  %s35_s26 = ssub.s32 %s1086_s13, %s1410_s25 }
  0x30   : > { %p1214_p10 = por %p1396_p8, %p45_p2  ;;  %p883_p12 = scmp.lt.s32.totalorder %s1090_s14, 2 }
  0x31   : > { %p36_p11 = scmp.eq.s32.totalorder %s35_s26, 0  ;;  %s144_s23 = sand.u32 1, %s1078_s11  }
  0x32   : > { %s746_s27 = sshll.u32 %s144_s23, 4  ;;  %s772_s29 = sshll.u32 %s1086_s13, 8 }
  0x33   : > { %s1223_s28 = scalar_select %p36_p11, %s1078_s11, %s38_s16  }
  0x34   : > { %s1229_s4 = scalar_lea.hbm %s1382_s0, %s772_s29  ;;  %s148_s18 = scalar_lea.vmem [#allocation2], %s746_s27 }
  0x35   : > { %s155_s5 = sshll.u32 %s148_s18, 4  ;;  %p1235_p13 = pnand %p883_p12, %p1208_p6  ;;  %s1231_s5 = int_to_ptr.vmem [resolvable:$true] %s155_s5 }
  0x36   : > { %s1239_s15 = scalar_lea.sflag [#allocation3], %s144_s23  ;;  %s974_s16 = scalar_lea.hbm %s1229_s4, 256 }
  0x37   : > { %p975_p0 = scmp.ne.s32.totalorder %s1229_s4, %s974_s16  ;;  %p976_p3 = pneg %p1235_p13 }
  0x38   : > { %s979_s22 = scalar_lea.hbm %s1382_s0, 512  ;;  %p980_p9 = scmp.lt.u32.totalorder %s1229_s4, %s1382_s0 }
  0x39   : > { %p977_p5 = pnand %p976_p3, %p975_p0  ;;  %p981_p1 = scmp.lt.u32.totalorder %s979_s22, %s974_s16 }
  0x3a   : > { %p983_p4 = scmp.lt.u32.totalorder %s974_s16, %s1229_s4 }
  0x3b   : > { %p978_p7 = pneg %p977_p5  ;;  %p982_p2 = por %p981_p1, %p980_p9 }
  0x3d   : > { %p984_p6 = por %p983_p4, %p982_p2 }
  0x3f   : > { %p985_p8 = pnand %p984_p6, %p978_p7 }
  0x41   : > { %988 = shalt.err (!%p985_p8)
}
  0x42   : > { %s989_s23 = scalar_lea.vmem %s1231_s5, 256  ;;  %s1095_s3 = smov [#allocation2]  }
  0x43   : > { %p990_p12 = scmp.ne.s32.totalorder %s1231_s5, %s989_s23  ;;  %s994_s18 = sshll.u32 %s1095_s3, 4  ;;  %s995_s18 = int_to_ptr.vmem [resolvable:$false] %s994_s18 }
  0x44   : > { %s996_s26 = scalar_lea.vmem %s995_s18, 512  ;;  %p997_p5 = scmp.lt.s32.totalorder %s1231_s5, %s995_s18 }
  0x45   : > { %p992_p11 = pnand %p990_p12, %p976_p3  ;;  %p998_p9 = scmp.lt.s32.totalorder %s996_s26, %s989_s23 }
  0x47   : > { %p993_p0 = pneg %p992_p11  ;;  %p999_p1 = por %p998_p9, %p997_p5 }
  0x49   : > { %p1000_p2 = pnand %p999_p1, %p993_p0 }
  0x4b   : > { %1003 = shalt.err (!%p1000_p2)
}
  0x4c   : > { %877 = dma.hbm_to_vmem [thread:$0]  (!%p1235_p13), %s1229_s4, 256, %s1231_s5, %s1239_s15, %s1093_s6, %s1093_s6, %s1094_s7  }
  0x4d   : > { %p1399_p3 = scmp.ne.s32.totalorder %s1393_s21, 0 }
  0x4e   : > { %s1273_s16 = sand.u32 (!%p1399_p3), 1, %s1074_s10   ;;  %p1400_p7 = scmp.ne.s32.totalorder (!%p1399_p3), %s1391_s19, 0 }
  0x4f   : > { %167 = sbr.rel (%p1399_p3) target bundleno = 789 (0x315), region = 28  ;;  %s750_s27 = sshll.u32 (!%p1399_p3), %s1273_s16, 4 }
  0x50   : > { %s170_s22 = scalar_lea.sflag (!%p1399_p3), [#allocation3], %s1273_s16  ;;  %s173_s29 = scalar_lea.vmem (!%p1399_p3), [#allocation2], %s750_s27 }
  0x56   : > { %1057 = dma.done.wait (%p1400_p7), %s170_s22, 256  }
  0x57   : > { %1059 = vsyncadd (%p1400_p7), %s170_s22, 4294967040  ;;  %p1401_p4 = scmp.ne.s32.totalorder %s1389_s17, 0 }
  0x59   : > { %1061 = dma.done.wait (%p1401_p4), [#allocation6], 512  }
  0x5a   : > { %1063 = vsyncadd (%p1401_p4), [#allocation6], 4294966784  ;;  %v1096_v0 = vmov 0.0   ;;  %vm1097_vm0 = vmmov 0   ;;  %vm212_vm1 = vcmask 1043456   ;;  %vm208_vm2 = vcmask 64512  }
  0x5b   : > { %813 = vmatprep.subr.bf16.mxu0 %v1096_v0  ;;  %815 = vmatprep.mubr.msk.bf16.mxu0 %vm1097_vm0, %v1096_v0  ;;  %v199_v1 = vld [vmem:[%s173_s29] sm:$0xf]  ;;  %v760_v2 = vld [vmem:[%s173_s29 + $0x8] sm:$0xf]  ;;  %v756_v3 = vld [vmem:[%s173_s29 + $0x4] sm:$0xf] }
  0x5c   : > { %789 = vmatprep.subr.bf16.mxu1 %v1096_v0  ;;  %791 = vmatprep.mubr.msk.bf16.mxu1 %vm1097_vm0, %v1096_v0  ;;  %v753_v4 = vcombine.low %v199_v1, %v199_v1  ;;  %v758_v5 = vcombine.low %v756_v3, %v756_v3  ;;  %v764_v6 = vld [vmem:[%s173_s29 + $0xc] sm:$0xf]  ;;  %v415_v7 = vsel %vm212_vm1, %v760_v2, 0  ;;  %v410_v8 = vld [vmem:[#allocation5 + $0x10] sm:$0xf]  ;;  %s1098_s17 = smov 120   ;;  %v762_v9 = vcombine.low %v760_v2, %v760_v2 }
  0x5d   : > { %814 = vmatpush3.bf16.msra.mxu0 %v415_v7  ;;  %v766_v10 = vcombine.low %v764_v6, %v764_v6  ;;  %v202_v13 = vld [vmem:[#allocation5 + $0x4] sm:$0xf]  ;;  %v260_v14 = vsel %vm212_vm1, %v199_v1, 0  ;;  %v459_v17 = vld [vmem:[#allocation5 + $0x14] sm:$0xf]  ;;  %v520_v18 = vsel %vm212_vm1, %v764_v6, 0 }
  0x5e   : > { %206 = vrot.lane.b32.xlu0 %v753_v4, %s1098_s17  ;;  %358 = vrot.lane.b32.xlu1 %v758_v5, %s1098_s17  ;;  %v200_v20 = vld [vmem:[#allocation5] sm:$0xf]  ;;  %v310_v21 = vsel %vm212_vm1, %v756_v3, 0  ;;  %v515_v23 = vld [vmem:[#allocation5 + $0x18] sm:$0xf]  ;;  %vm617_vm3 = vcmask 523264  }
  0x5f   : > { %819 = vmatprep.subr.bf16.mxu0 %v1096_v0  ;;  %v305_v25 = vld [vmem:[#allocation5 + $0x8] sm:$0xf]  ;;  %v564_v27 = vld [vmem:[#allocation5 + $0x1c] sm:$0xf]  ;;  %v354_v28 = vld [vmem:[#allocation5 + $0xc] sm:$0xf] }
  0x60   : > { %816 = vmatmul.mubr.msk.bf16.vlgmr.msra.gmra.mrb[0].mxu0 %vm208_vm2, %v410_v8  ;;  %s752_s19 = sshll.u32 %s1273_s16, 3  ;;  %s769_s21 = sshll.u32 %s1082_s12, 7 }
  0x61   : > { %821 = vmatprep.mubr.msk.bf16.mxu0 %vm1097_vm0, %v1096_v0  ;;  %s197_s6 = scalar_lea.vmem [#allocation7], %s752_s19  ;;  %s1332_s8 = scalar_lea.hbm %s1384_s2, %s769_s21 }
  0x62   : > { %463 = vrot.lane.b32.xlu0 %v762_v9, %s1098_s17  ;;  %568 = vrot.lane.b32.xlu1 %v766_v10, %s1098_s17  ;;  %s650_s7 = sshll.u32 %s197_s6, 4  ;;  %s636_s15 = scalar_lea.sflag [#allocation4], %s1273_s16  ;;  %s1334_s7 = int_to_ptr.vmem [resolvable:$true] %s650_s7 }
  0x63   : > { %s1004_s30 = scalar_lea.vmem %s1334_s7, 128  ;;  %s1099_s12 = smov [#allocation7]  }
  0x64   : > { %p1005_p13 = scmp.ne.s32.totalorder %s1334_s7, %s1004_s30  ;;  %s1008_s23 = sshll.u32 %s1099_s12, 4  ;;  %s1009_s23 = int_to_ptr.vmem [resolvable:$false] %s1008_s23 }
  0x65   : > { %s1010_s3 = scalar_lea.vmem %s1009_s23, 256  ;;  %p1011_p12 = scmp.lt.s32.totalorder %s1334_s7, %s1009_s23 }
  0x66   : > { %p1006_p6 = pnand %p1005_p13, %p1214_p10  ;;  %p1012_p11 = scmp.lt.s32.totalorder %s1010_s3, %s1004_s30 }
  0x68   : > { %p1007_p8 = pneg %p1006_p6  ;;  %p1013_p0 = por %p1012_p11, %p1011_p12 }
  0x6a   : > { %p1014_p5 = pnand %p1013_p0, %p1007_p8 }
  0xd0   : > { %v207_v11 = vpop.permute.xlu0 %206  ;;  %v359_v19 = vpop.permute.xlu1 %358 }
  0xd1   : > { %v214_v12 = vsel %vm212_vm1, %v207_v11, 0  ;;  %v364_v26 = vsel %vm212_vm1, %v359_v19, 0 }
  0xd2   : > { %790 = vmatpush3.bf16.msra.mxu1 %v214_v12 }
  0xd3   : > { %795 = vmatprep.subr.bf16.mxu1 %v1096_v0 }
  0xd4   : > { %v464_v15 = vpop.permute.xlu0 %463  ;;  %v569_v22 = vpop.permute.xlu1 %568 }
  0xd5   : > { %v469_v16 = vsel %vm212_vm1, %v464_v15, 0  ;;  %792 = vmatmul.mubr.msk.bf16.vlgmr.msra.gmra.mrb[0].mxu1 %vm208_vm2, %v202_v13  ;;  %v574_v24 = vsel %vm212_vm1, %v569_v22, 0 }
  0xd6   : > { %796 = vmatpush3.bf16.msra.mxu1 %v260_v14  ;;  %820 = vmatpush3.bf16.msra.mxu0 %v469_v16 }
  0xd7   : > { %797 = vmatprep.mubr.msk.bf16.mxu1 %vm1097_vm0, %v1096_v0  ;;  %801 = vmatprep.subr.bf16.mxu1 %v1096_v0 }
  0xd8   : > { %825 = vmatprep.subr.bf16.mxu0 %v1096_v0 }
  0xd9   : > { %822 = vmatmul.mubr.msk.bf16.vlgmr.msra.gmra.mrb[0].mxu0 %vm208_vm2, %v459_v17 }
  0xda   : > { %826 = vmatpush3.bf16.msra.mxu0 %v520_v18  ;;  %827 = vmatprep.mubr.msk.bf16.mxu0 %vm1097_vm0, %v1096_v0 }
  0xdb   : > { %831 = vmatprep.subr.bf16.mxu0 %v1096_v0 }
  0xe1   : > { %798 = vmatmul.mubr.msk.bf16.vlgmr.msra.gmra.mrb[0].mxu1 %vm208_vm2, %v200_v20 }
  0xe2   : > { %802 = vmatpush3.bf16.msra.mxu1 %v310_v21  ;;  %803 = vmatprep.mubr.msk.bf16.mxu1 %vm1097_vm0, %v1096_v0 }
  0xe3   : > { %807 = vmatprep.subr.bf16.mxu1 %v1096_v0 }
  0xe5   : > { %828 = vmatmul.mubr.msk.bf16.vlgmr.msra.gmra.mrb[0].mxu0 %vm208_vm2, %v515_v23 }
  0xe6   : > { %832 = vmatpush3.bf16.msra.mxu0 %v574_v24  ;;  %833 = vmatprep.mubr.msk.bf16.mxu0 %vm1097_vm0, %v1096_v0 }
  0xed   : > { %804 = vmatmul.mubr.msk.bf16.vlgmr.msra.gmra.mrb[0].mxu1 %vm208_vm2, %v305_v25 }
  0xee   : > { %808 = vmatpush3.bf16.msra.mxu1 %v364_v26  ;;  %809 = vmatprep.mubr.msk.bf16.mxu1 %vm1097_vm0, %v1096_v0 }
  0xf1   : > { %834 = vmatmul.mubr.msk.bf16.vlgmr.msra.gmra.mrb[0].mxu0 %vm208_vm2, %v564_v27 }
  0xf9   : > { %810 = vmatmul.mubr.msk.bf16.vlgmr.msra.gmra.mrb[0].mxu1 %vm208_vm2, %v354_v28 }
 0x1c4   : > { %v610_v29 = vpop.f32.mrb[0].mxu0 }
 0x1c5   : > { %v835_v30 = vpop.f32.mrb[1].mxu0 }
 0x1c6   : > { %v613_v31 = vpop.f32.mrb[2].mxu0 }
 0x1c7   : > { %v836_v32 = vpop.f32.mrb[3].mxu0 }
 0x1cc   : > { %v400_v33 = vpop.f32.mrb[0].mxu1 }
 0x1cd   : > { %v837_v34 = vadd.f32 %v610_v29, %v400_v33  ;;  %v811_v35 = vpop.f32.mrb[1].mxu1 }
 0x1ce   : > { %v403_v36 = vpop.f32.mrb[2].mxu1 }
 0x1cf   : > { %v812_v37 = vpop.f32.mrb[3].mxu1  ;;  %v618_v38 = vsel %vm617_vm3, %v837_v34, 0.0 }
 0x1d0   : > { %619 = vadd.xlane.f32.xlu0 %v618_v38 }
 0x25d   : > { %v620_v39 = vpop.xlane.xlu0 %619 }
 0x25e   : > { %v621_v40 = vmul.f32 0.015625, %v620_v39 }
 0x260   : > { %v622_v41 = vsub.f32 %v837_v34, %v621_v40 }
 0x262   : > { %v623_v42 = vmul.f32 %v622_v41, %v622_v41 }
 0x264   : > { %v624_v43 = vsel %vm617_vm3, %v623_v42, 0.0 }
 0x265   : > { %625 = vadd.xlane.f32.xlu1 %v624_v43 }
 0x2f2   : > { %v626_v44 = vpop.xlane.xlu1 %625 }
 0x2f3   : > { %v627_v45 = vmul.f32 0.015625, %v626_v44 }
 0x2f5   : > { %v628_v46 = vadd.f32 1e-05, %v627_v45 }
 0x2f7   : > { %944 = vrsqrt.f32 %v628_v46 }
 0x301   : > { %v945_v47 = vpop.eup %944 }
 0x302   : > { %v630_v48 = vmul.f32 %v945_v47, %v622_v41 }
 0x304   : > { %vm631_vm4 = vcmp.gt.f32.partialorder %v630_v48, 0.0  ;;  %v632_v49 = vmul.f32 0.2, %v630_v48 }
 0x306   : > { %v633_v50 = vsel %vm631_vm4, %v630_v48, %v632_v49 }
 0x307   : > { %634 = vst.msk [vmem:[%s197_s6] sm:$0xff] %vm617_vm3, %v633_v50 }
 0x308   : > { %1017 = shalt.err (!%p1014_p5)
}
 0x309   : > { %s1018_s18 = scalar_lea.hbm %s1332_s8, 128  ;;  %s1022_s27 = scalar_lea.hbm %s1384_s2, 256 }
 0x30a   : > { %p1019_p9 = scmp.ne.s32.totalorder %s1332_s8, %s1018_s18  ;;  %p1023_p3 = scmp.lt.u32.totalorder %s1332_s8, %s1384_s2 }
 0x30b   : > { %p1024_p7 = scmp.lt.u32.totalorder %s1022_s27, %s1018_s18  ;;  %p1026_p13 = scmp.lt.u32.totalorder %s1018_s18, %s1332_s8 }
 0x30c   : > { %p1020_p1 = pnand %p1019_p9, %p1214_p10 }
 0x30d   : > { %p1025_p4 = por %p1024_p7, %p1023_p3 }
 0x30e   : > { %p1021_p2 = pneg %p1020_p1 }
 0x30f   : > { %p1027_p6 = por %p1026_p13, %p1025_p4 }
 0x311   : > { %p1028_p8 = pnand %p1027_p6, %p1021_p2 }
 0x313   : > { %1031 = shalt.err (!%p1028_p8)
}
 0x314   : > { %868 = dma.vmem_to_hbm [thread:$0]  (%p1214_p10), %s1334_s7, 128, %s1332_s8, %s636_s15  }
 0x315 PF: > { %s662_s17 = sand.u32 1, %s1070_s9   ;;  %p1402_p12 = scmp.ne.s32.totalorder %s1392_s20, 0 }
 0x316   : > { %p1403_p11 = scmp.ge.s32.totalorder %s1090_s14, 2  ;;  %s663_s19 = scalar_lea.sflag [#allocation4], %s662_s17 }
 0x318   : > { %p879_p0 = pnand %p1403_p11, %p1402_p12 }
 0x31a   : > { %1065 = dma.done.wait (!%p879_p0), %s663_s19, 128  }
 0x31b   : > { %1067 = vsyncadd (!%p879_p0), %s663_s19, 4294967168  ;;  %s19_s14 = sadd.s32 1, %s1090_s14   ;;  %s1404_s9 = smov %s1074_s10 }
 0x31c   : > { %p16_p5 = scmp.ge.s32.totalorder %s19_s14, 4   ;;  %s1405_s10 = smov %s1078_s11 }
 0x31d   : > { %s1406_s11 = smov %s1223_s28  ;;  %s1407_s12 = smov %s1086_s13 }
 0x31e   : > { %s1408_s13 = smov %s1410_s25  ;;  %18 = sbr.rel (!%p16_p5) target bundleno = 7 (0x7), region = 88 }
 0x325   :  { %668 = vsyncpa [#allocation3], 1 }
 0x326   :  { %670 = vsyncpa [#allocation3 + $0x1], 1 }
 0x327   :  { %671 = vsyncpa [#allocation6], 1 }
 0x328   :  { %672 = vsyncpa [#allocation4], 1 }
 0x329   :  { %674 = vsyncpa [#allocation4 + $0x1], 1 }

</bundles_post_ra>
